<compile_context>
chip_gen: v7x
topology: tpu7x:2x2x1
jax: 0.10.0
libtpu: 0.0.40
codegen_flags: <defaults>
</compile_context>

<pallas_src>
import functools
from types import SimpleNamespace

import jax
import jax.numpy as jnp
from jax.experimental import pallas as pl
from jax.experimental.pallas import tpu as pltpu


def _rope_kernel(start_ref, freq_ref, x_ref, o_ref, *, tile_b, tile_t, dim):
    """start_ref: SMEM (1,) int32 runtime start index.
    freq_ref:  (1, D) f32 signed frequencies [-f0, +f0, -f1, +f1, ..., 0...].
    x_ref/o_ref: (tile_b, tile_t, D) activation block."""
    # Sequence positions of this T-tile (shared by every batch row in the block).
    t0 = start_ref[0] + pl.program_id(1) * tile_t
    pos = (t0 + jax.lax.broadcasted_iota(jnp.int32, (tile_t, 1), 0)
           ).astype(jnp.float32)                              # (tile_t, 1)

    freq = freq_ref[...]                                      # (1, D)
    angles = pos * freq                                       # (tile_t, D)
    c = jnp.cos(angles)                                       # cos(-a) == cos(a): sign-free
    s = jnp.sin(angles)                                       # sign baked into freq; 0 on tail
    neg = freq < 0.0                                          # parity mask (even lanes)

    def rotate_row(b):
        x = x_ref[b].astype(jnp.float32)                      # (tile_t, D)
        x_prev = pltpu.roll(x, shift=1, axis=1)               # x_prev[., i] = x[., i-1]
        x_next = pltpu.roll(x, shift=dim - 1, axis=1)         # x_next[., i] = x[., i+1]
        swapped = jnp.where(neg, x_next, x_prev)              # even -> x[i+1], odd -> x[i-1]
        o_ref[b] = (x * c + swapped * s).astype(o_ref.dtype)

    if tile_b == 1:
        rotate_row(0)
    else:
        # Batch-packed block: trig above is hoisted out of this loop.
        @pl.loop(0, tile_b)
        def _(b):
            rotate_row(b)


def _signed_inv_freq(dim, rope_length):
    """(1, D) f32: interleaved [-f0, +f0, -f1, +f1, ...], zeros on the tail."""
    half = rope_length // 2
    inv_freq = 1.0 / (10000.0 ** (jnp.arange(half, dtype=jnp.float32) / half))
    signed = jnp.stack([-inv_freq, inv_freq], axis=-1).reshape(rope_length)
    tail = jnp.zeros((dim - rope_length,), jnp.float32)
    return jnp.concatenate([signed, tail]).reshape(1, dim)


def _pick_tiles(batch, seq_len, dim, itemsize, max_tile_bytes=1 << 20):
    """Pick (tile_b, tile_t) for the (B, T, D) activation array.

    tile_t is a multiple of 8 (hard (8,128) constraint) or equals the full T;
    tile_b has no alignment constraint.  The block stays near max_tile_bytes of
    activations and the grid keeps >= 2 steps whenever the problem allows.
    """
    sub = {1: 32, 2: 16}.get(itemsize, 8)           # packed-sublane row multiple
    budget_rows = max(8, max_tile_bytes // (itemsize * dim))

    if seq_len >= budget_rows or batch == 1:
        # Long sequence (or nothing to pack): tile along T only.
        if seq_len <= sub:
            return 1, seq_len                        # block dim == full T (always legal)
        tile_t = min(budget_rows, max(seq_len // 2, sub))
        tile_t = max(8, (tile_t // sub) * sub)
        return 1, tile_t

    # Short sequence, batch > 1: whole sequence per block, pack batch rows,
    # but keep the batch grid >= 2 so both v7x TensorCores get work.
    tile_b = max(1, min(budget_rows // seq_len, (batch + 1) // 2))
    return tile_b, seq_len


def rotary_embedding(x, rope_length=None, start_index=0):
    """Pallas forward of RotaryEmbedding. x: (B, T, D); start_index may be a
    Python int or a traced scalar (no recompile per decode step)."""
    B, T, D = x.shape
    rope_length = D if rope_length is None else rope_length
    assert D % 2 == 0 and rope_length % 2 == 0 and rope_length <= D

    tile_b, tile_t = _pick_tiles(B, T, D, x.dtype.itemsize)
    freq = _signed_inv_freq(D, rope_length)
    start = jnp.asarray(start_index, dtype=jnp.int32).reshape(1)

    kernel = functools.partial(_rope_kernel, tile_b=tile_b, tile_t=tile_t, dim=D)

    # VMEM budget from actual usage (double-buffered in/out + f32 temporaries),
    # kept well under the 64 MiB/TC available on v7x.
    blk_elems = tile_b * tile_t * D
    vmem_limit = int(min(48 << 20,
                         max(16 << 20,
                             4 * blk_elems * x.dtype.itemsize    # 2x in + 2x out buffers
                             + 8 * blk_elems * 4                 # f32 elementwise temporaries
                             + (2 << 20))))

    out = pl.pallas_call(
        kernel,
        out_shape=jax.ShapeDtypeStruct((B, T, D), x.dtype),
        grid_spec=pltpu.PrefetchScalarGridSpec(
            num_scalar_prefetch=1,
            grid=(pl.cdiv(B, tile_b), pl.cdiv(T, tile_t)),
            in_specs=[
                # Tiny constant frequency vector: same block every step, so it
                # is fetched once and re-used (no per-step table DMA).
                pl.BlockSpec((1, D), lambda b, t, s: (0, 0)),
                # Activation block: (batch rows, seq rows, full D).
                pl.BlockSpec((tile_b, tile_t, D), lambda b, t, s: (b, t, 0)),
            ],
            out_specs=pl.BlockSpec((tile_b, tile_t, D), lambda b, t, s: (b, t, 0)),
        ),
        compiler_params=pltpu.CompilerParams(
            dimension_semantics=("parallel", "parallel"),
            vmem_limit_bytes=vmem_limit),
    )(start, freq, x)
    return out


def rotary_embedding_ref(x, rope_length, start_index=0):
    """Pure-JAX mirror of the torch forward (for verification)."""
    T, D = x.shape[-2], x.shape[-1]
    half = rope_length // 2
    inv_freq = 1.0 / (10000.0 ** (jnp.arange(half, dtype=jnp.float32) / half))
    pos = jnp.arange(start_index, start_index + T, dtype=jnp.float32)
    angles = pos[:, None] * inv_freq[None, :]
    sin_a, cos_a = jnp.sin(angles), jnp.cos(angles)
    x_even = x[..., 0:rope_length:2]
    x_odd = x[..., 1:rope_length:2]
    rot_even = x_even * cos_a - x_odd * sin_a
    rot_odd = x_even * sin_a + x_odd * cos_a
    rot = jnp.stack([rot_even, rot_odd], axis=-1).reshape(
        x.shape[:-1] + (rope_length,))
    return jnp.concatenate([rot, x[..., rope_length:]], axis=-1)


if __name__ == "__main__":
    # Mirrors RotaryEmbedding(config=SimpleNamespace(rope_length=96), size=128)
    config = SimpleNamespace(rope_length=96)
    dim = 128

    # Case 1: f32 activations, start_index = 0.
    B, T = 2, 16
    x = jax.random.normal(jax.random.PRNGKey(0), (B, T, dim), dtype=jnp.float32)
    out = jax.block_until_ready(
        rotary_embedding(x, rope_length=config.rope_length, start_index=0))
    ref = rotary_embedding_ref(x, rope_length=config.rope_length, start_index=0)
    assert out.shape == x.shape and out.dtype == x.dtype
    assert jnp.allclose(out, ref, rtol=1e-5, atol=1e-5), "f32 mismatch vs reference"

    # Case 2: bf16 activations, ragged T (no multiple-of-8 divisor), runtime
    # start_index (decode-style scalar).
    xb = jax.random.normal(jax.random.PRNGKey(1), (3, 13, dim), dtype=jnp.bfloat16)
    start = jnp.int32(5)
    out_b = jax.block_until_ready(
        rotary_embedding(xb, rope_length=config.rope_length, start_index=start))
    ref_b = rotary_embedding_ref(xb.astype(jnp.float32),
                                 rope_length=config.rope_length, start_index=5)
    assert out_b.shape == xb.shape and out_b.dtype == xb.dtype
    assert jnp.allclose(out_b.astype(jnp.float32), ref_b, rtol=2e-2, atol=2e-2), \
        "bf16 mismatch vs reference"

    print("KERNEL_OK")
</pallas_src>

<mosaic_0001>
module attributes {stable_mosaic.version = 11 : i64} {
  func.func @_rope_kernel(%arg0: i32, %arg1: i32, %arg2: memref<1xi32, #tpu.memory_space<smem>>, %arg3: memref<1x128xf32, #tpu.memory_space<vmem>>, %arg4: memref<1x16x128xf32, #tpu.memory_space<vmem>>, %arg5: memref<1x16x128xf32, #tpu.memory_space<vmem>>) attributes {dimension_semantics = [#tpu.dimension_semantics<parallel>, #tpu.dimension_semantics<parallel>], iteration_bounds = array<i64: 2, 1>, scalar_prefetch = 1 : i64, scratch_operands = 0 : i64, tpu.core_type = #tpu.core_type<tc>, window_params = [{pipeline_mode = #tpu.pipeline_mode<synchronous>, transform_indices = @transform_0, window_bounds = array<i64: 1, 128>}, {transform_indices = @transform_1, window_bounds = array<i64: 1, 16, 128>}, {transform_indices = @transform_2, window_bounds = array<i64: 1, 16, 128>}]} {
    %c0 = arith.constant 0 : index
    %0 = memref.load %arg2[%c0] : memref<1xi32, #tpu.memory_space<smem>>
    %c16_i32 = arith.constant 16 : i32
    %1 = arith.muli %arg1, %c16_i32 : i32
    %2 = arith.addi %0, %1 : i32
    %3 = tpu.iota {dimensions = array<i32: 0>} : vector<16x1xi32>
    %4 = vector.broadcast %2 : i32 to vector<16x1xi32>
    %5 = arith.addi %4, %3 : vector<16x1xi32>
    %6 = arith.sitofp %5 : vector<16x1xi32> to vector<16x1xf32>
    %c0_0 = arith.constant 0 : index
    %c0_1 = arith.constant 0 : index
    %7 = vector.load %arg3[%c0_0, %c0_1] : memref<1x128xf32, #tpu.memory_space<vmem>>, vector<1x128xf32>
    %8 = vector.broadcast %6 : vector<16x1xf32> to vector<16x128xf32>
    %9 = vector.broadcast %7 : vector<1x128xf32> to vector<16x128xf32>
    %10 = arith.mulf %8, %9 : vector<16x128xf32>
    %11 = math.cos %10 : vector<16x128xf32>
    %12 = math.sin %10 : vector<16x128xf32>
    %cst = arith.constant 0.000000e+00 : f32
    %13 = vector.broadcast %cst : f32 to vector<1x128xf32>
    %14 = arith.cmpf olt, %7, %13 : vector<1x128xf32>
    %c0_2 = arith.constant 0 : index
    %c0_3 = arith.constant 0 : index
    %c0_4 = arith.constant 0 : index
    %15 = vector.load %arg4[%c0_2, %c0_3, %c0_4] : memref<1x16x128xf32, #tpu.memory_space<vmem>>, vector<1x16x128xf32>
    %16 = vector.shape_cast %15 : vector<1x16x128xf32> to vector<16x128xf32>
    %c1_i32 = arith.constant 1 : i32
    %17 = tpu.dynamic_rotate %16 by %c1_i32 dim 1 : vector<16x128xf32>, i32 -> vector<16x128xf32>
    %c127_i32 = arith.constant 127 : i32
    %18 = tpu.dynamic_rotate %16 by %c127_i32 dim 1 : vector<16x128xf32>, i32 -> vector<16x128xf32>
    %19 = vector.shape_cast %14 : vector<1x128xi1> to vector<1x128xi1>
    %20 = vector.broadcast %19 : vector<1x128xi1> to vector<16x128xi1>
    %21 = arith.select %20, %18, %17 : vector<16x128xi1>, vector<16x128xf32>
    %22 = arith.mulf %16, %11 : vector<16x128xf32>
    %23 = arith.mulf %21, %12 : vector<16x128xf32>
    %24 = arith.addf %22, %23 : vector<16x128xf32>
    %c0_5 = arith.constant 0 : index
    %c0_6 = arith.constant 0 : index
    %c0_7 = arith.constant 0 : index
    %25 = vector.load %arg5[%c0_5, %c0_6, %c0_7] : memref<1x16x128xf32, #tpu.memory_space<vmem>>, vector<1x16x128xf32>
    %26 = vector.shape_cast %25 : vector<1x16x128xf32> to vector<16x128xf32>
    %27 = vector.shape_cast %24 : vector<16x128xf32> to vector<1x16x128xf32>
    tpu.vector_store %arg5[%c0_5, %c0_6, %c0_7], %27 {strides = array<i32>} : memref<1x16x128xf32, #tpu.memory_space<vmem>>, vector<1x16x128xf32>,
    return
  }
  func.func @transform_0(%arg0: i32, %arg1: i32, %arg2: memref<1xi32, #tpu.memory_space<smem>>) -> (i32, i32) {
    %c0_i32 = arith.constant 0 : i32
    %c0_i32_0 = arith.constant 0 : i32
    %c0_i32_1 = arith.constant 0 : i32
    return %c0_i32, %c0_i32_0 : i32, i32
  }
  func.func @transform_1(%arg0: i32, %arg1: i32, %arg2: memref<1xi32, #tpu.memory_space<smem>>) -> (i32, i32, i32) {
    %c0_i32 = arith.constant 0 : i32
    %c0_i32_0 = arith.constant 0 : i32
    return %arg0, %arg1, %c0_i32 : i32, i32, i32
  }
  func.func @transform_2(%arg0: i32, %arg1: i32, %arg2: memref<1xi32, #tpu.memory_space<smem>>) -> (i32, i32, i32) {
    %c0_i32 = arith.constant 0 : i32
    %c0_i32_0 = arith.constant 0 : i32
    return %arg0, %arg1, %c0_i32 : i32, i32, i32
  }
}

</mosaic_0001>

<bundles_post_ra>
// kernel: tpu_custom_call.1
= control target key start
LH: loop header
LB: loop body
LE: loop exit
PB: predicated region body
PF: predicated region fallthrough
CT: control target
= control target key end

     0   :  { %s1298_s0 = inlined_call_operand.<no memory space> [shape: s32[1], index: 0, kind: input, shape index: {}]   ;;  %s1299_s1 = inlined_call_operand.vmem [shape: f32[1,128], index: 1, kind: input, shape index: {}]   ;;  %s1300_s2 = inlined_call_operand.hbm [shape: f32[2,16,128], index: 2, kind: input, shape index: {}]   ;;  %s1301_s3 = inlined_call_operand.hbm [shape: f32[2,16,128], index: 3, kind: output, shape index: {}]  }
   0x1   :  { %8 = sst [smem:[#allocation3]] %s1298_s0 }
   0x2   :  { %9 = vsyncpa [#allocation5], 0 }
   0x3   :  { %11 = vsyncpa [#allocation5 + $0x1], 0 }
   0x4   :  { %12 = vsyncpa [#allocation6], 0 }
   0x5   :  { %14 = vsyncpa [#allocation6 + $0x1], 0  ;;  %s1024_s14 = smov 0   ;;  %s1026_s15 = smov 0  }
   0x6   :  { %s1028_s16 = smov 0   ;;  %s1030_s17 = smov 0  }
   0x7   :  { %s1032_s18 = smov 0   ;;  %s1034_s19 = smov 0  }
   0x8 LB: > { %s748_s0 = sadd.s32 4294967295, %s984_s19   ;;  %s749_s20 = sadd.s32 4294967294, %s984_s19   ;;  %s984_s19 = sphi %s1034_s19, %s20_s19   ;;  %s980_s18 = sphi %s1032_s18, %s1316_s18   ;;  %s976_s17 = sphi %s1030_s17, %s1315_s17   ;;  %s972_s16 = sphi %s1028_s16, %s1314_s16   ;;  %s968_s15 = sphi %s1026_s15, %s1313_s15   ;;  %s964_s14 = sphi %s1024_s14, %s1312_s14  }
   0x9   : > { %s32_s21 = sadd.s32 1, %s980_s18  ;;  %s62_s22 = sadd.s32 1, %s972_s16 }
   0xa   : > { %p34_p0 = scmp.ge.s32.totalorder %s32_s21, 2  ;;  %p69_p1 = scmp.ne.s32.totalorder %s972_s16, %s968_s15 }
   0xb   : > { %p70_p2 = scmp.eq.s32.totalorder %s984_s19, 0  ;;  %p75_p3 = scmp.ne.s32.totalorder %s968_s15, %s964_s14 }
   0xc   : > { %s1318_s21 = smov (%p34_p0, %s32_s21), 0  ;;  %p76_p5 = scmp.eq.s32.totalorder %s748_s0, 0 }
   0xd   : > { %p1065_p4 = por %p70_p2, %p69_p1  ;;  %s57_s24 = ssub.s32 %s980_s18, %s1318_s21 }
   0xe   : > { %p101_p6 = scmp.eq.s32.totalorder %s748_s0, 1  ;;  %p60_p7 = scmp.eq.s32.totalorder %s57_s24, 0 }
   0xf   : > { %p1071_p8 = por %p76_p5, %p75_p3  ;;  %p107_p10 = scmp.eq.s32.totalorder %s749_s20, 1 }
  0x10   : > { %p1075_p9 = por %p101_p6, %p69_p1  ;;  %p801_p13 = scmp.lt.s32.totalorder %s984_s19, 2 }
  0x11   : > { %s1080_s27 = scalar_select %p60_p7, %s972_s16, %s62_s22  }
  0x12   : > { %s1305_s26 = scalar_select %p1075_p9, 1, 0 }
  0x13   : > { %p1082_p11 = por %p107_p10, %p75_p3  ;;  %s130_s29 = sand.u32 1, %s972_s16  }
  0x14   : > { %s752_s30 = sshll.u32 %s130_s29, 4  ;;  %s779_s4 = sshll.u32 %s980_s18, 8 }
  0x15   : > { %s1306_s28 = scalar_select %p1082_p11, 1, 0 }
  0x16   : > { %s1093_s7 = scalar_lea.hbm %s1300_s2, %s779_s4  ;;  %s134_s8 = scalar_lea.vmem [#allocation4], %s752_s30 }
  0x17   : > { %s143_s9 = sshll.u32 %s134_s8, 4  ;;  %p1099_p0 = pnand %p801_p13, %p1065_p4  ;;  %s1095_s9 = int_to_ptr.vmem [resolvable:$true] %s143_s9 }
  0x18   : > { %s1104_s11 = scalar_lea.sflag [#allocation5], %s130_s29  ;;  %s872_s12 = scalar_lea.hbm %s1093_s7, 256 }
  0x19   : > { %p873_p2 = scmp.ne.s32.totalorder %s1093_s7, %s872_s12  ;;  %p874_p3 = pneg %p1099_p0 }
  0x1a   : > { %s877_s20 = scalar_lea.hbm %s1300_s2, 512  ;;  %p878_p4 = scmp.lt.u32.totalorder %s1093_s7, %s1300_s2 }
  0x1b   : > { %p875_p5 = pnand %p874_p3, %p873_p2  ;;  %p879_p7 = scmp.lt.u32.totalorder %s877_s20, %s872_s12 }
  0x1c   : > { %p881_p13 = scmp.lt.u32.totalorder %s872_s12, %s1093_s7 }
  0x1d   : > { %p876_p6 = pneg %p875_p5  ;;  %p880_p10 = por %p879_p7, %p878_p4 }
  0x1f   : > { %p882_p12 = por %p881_p13, %p880_p10 }
  0x21   : > { %p883_p1 = pnand %p882_p12, %p876_p6 }
  0x23   : > { %886 = shalt.err (!%p883_p1)
}
  0x24   : > { %s887_s24 = scalar_lea.vmem %s1095_s9, 256  ;;  %s986_s29 = smov [#allocation4]  }
  0x25   : > { %p888_p2 = scmp.ne.s32.totalorder %s1095_s9, %s887_s24  ;;  %s892_s30 = sshll.u32 %s986_s29, 4  ;;  %s893_s30 = int_to_ptr.vmem [resolvable:$false] %s892_s30 }
  0x26   : > { %s894_s4 = scalar_lea.vmem %s893_s30, 512  ;;  %p895_p9 = scmp.lt.s32.totalorder %s1095_s9, %s893_s30 }
  0x27   : > { %p890_p5 = pnand %p888_p2, %p874_p3  ;;  %p896_p4 = scmp.lt.s32.totalorder %s894_s4, %s887_s24 }
  0x29   : > { %p891_p11 = pneg %p890_p5  ;;  %p897_p7 = por %p896_p4, %p895_p9 }
  0x2b   : > { %p898_p10 = pnand %p897_p7, %p891_p11 }
  0x2d   : > { %901 = shalt.err (!%p898_p10)
}
  0x2e   : > { %s987_s5 = smov 128   ;;  %s988_s6 = smov 8  }
  0x2f   : > { %796 = dma.hbm_to_vmem [thread:$0]  (!%p1099_p0), %s1093_s7, 256, %s1095_s9, %s1104_s11, %s987_s5, %s987_s5, %s988_s6  }
  0x30   : > { %p151_p12 = scmp.lt.s32.totalorder %s984_s19, 3  ;;  %p1308_p1 = scmp.ge.s32.totalorder %s984_s19, 1 }
  0x32   : > { %p152_p3 = pnand %p1308_p1, %p151_p12 }
  0x33   : > { %s1136_s8 = sand.u32 (!%p152_p3), 1, %s968_s15  }
  0x34   : > { %155 = sbr.rel (%p152_p3) target bundleno = 201 (0xc9), region = 28  ;;  %s756_s12 = sshll.u32 (!%p152_p3), %s1136_s8, 4 }
  0x35   : > { %s158_s13 = scalar_lea.sflag (!%p152_p3), [#allocation5], %s1136_s8  ;;  %s161_s0 = scalar_lea.vmem (!%p152_p3), [#allocation4], %s756_s12 }
  0x3b   : > { %955 = dma.done.wait (%p1071_p8), %s158_s13, 256  }
  0x3c   : > { %957 = vsyncadd (%p1071_p8), %s158_s13, 4294967040  ;;  %v187_v0 = vlaneseq  ;;  %s184_s7 = sld [smem:[#allocation3]]  ;;  %v1146_v5 = vld [vmem:[%s161_s0] sm:$0xff]  ;;  %s989_s11 = smov 127   ;;  %v1153_v10 = vld [vmem:[%s161_s0 + $0x8] sm:$0xff]  ;;  %v991_v11 = vmov 0  }
  0x3d   : > { %v195_v6 = vld [vmem:[%s1299_s1] sm:$0x1]  ;;  %625 = vrot.lane.b32.xlu1 %v1146_v5, %s989_s11  ;;  %s990_s20 = smov 1   ;;  %v992_v40 = vmov 683565275   ;;  %s181_s25 = scalar_lea.vmem [#allocation7], %s756_s12 }
  0x3e   : > { %v188_v1 = vshrl.u32 %v187_v0, 7  ;;  %621 = vrot.lane.b32.xlu0 %v1146_v5, %s990_s20  ;;  %vm618_vm0 = vcmp.lt.f32.partialorder %v195_v6, 0.0  ;;  %v993_v42 = vmov 2475754826   ;;  %v994_v44 = vmov 2131351028  }
  0x3f   : > { %v629_v12 = vsel %vm618_vm0, 1, %v991_v11  ;;  %v995_v46 = vmov 2102212464   ;;  %v996_v48 = vmov 920167782   ;;  %s661_s22 = sshll.u32 %s181_s25, 4  ;;  %s1244_s22 = int_to_ptr.vmem [resolvable:$true] %s661_s22 }
  0x40   : > { %v199_v2 = vsub.s32 0, %v188_v1  ;;  %v189_v3 = vadd.s32 8, %v188_v1  ;;  %v997_v56 = vmov 1326507024   ;;  %s780_s23 = sshll.u32 %s976_s17, 8  ;;  %s646_s4 = scalar_lea.sflag [#allocation6], %s1136_s8 }
  0x41   : > { %627 = vrot.lane.b32.xlu1 %v1153_v10, %s989_s11  ;;  %s1249_s30 = scalar_lea.hbm %s1301_s3, %s780_s23  ;;  %s902_s5 = scalar_lea.vmem %s1244_s22, 256 }
  0x42   : > { %v190_v4 = vstv %s184_s7  ;;  %v200_v8 = vrot.slane %v195_v6, %v199_v2  ;;  %v1155_v15 = vrot.slane %v629_v12, %v199_v2  ;;  %623 = vrot.lane.b32.xlu0 %v1153_v10, %s990_s20  ;;  %p903_p8 = scmp.ne.s32.totalorder %s1244_s22, %s902_s5  ;;  %p1309_p9 = scmp.ne.s32.totalorder %s1305_s26, 0 }
  0x43   : > { %v191_v7 = vadd.s32 %v190_v4, %v188_v1  ;;  %v192_v9 = vadd.s32 %v190_v4, %v189_v3  ;;  %s998_s17 = smov [#allocation7]  }
  0x44   : > { %p904_p11 = pnand %p903_p8, %p1309_p9  ;;  %s906_s6 = sshll.u32 %s998_s17, 4  ;;  %s907_s6 = int_to_ptr.vmem [resolvable:$false] %s906_s6 }
  0x45   : > { %v193_v13 = vcvt.s32.f32 %v191_v7  ;;  %v194_v14 = vcvt.s32.f32 %v192_v9  ;;  %s908_s12 = scalar_lea.vmem %s907_s6, 512  ;;  %p909_p6 = scmp.lt.s32.totalorder %s1244_s22, %s907_s6 }
  0x46   : > { %p905_p0 = pneg %p904_p11  ;;  %p910_p13 = scmp.lt.s32.totalorder %s908_s12, %s902_s5 }
  0x47   : > { %v1157_v16 = vmul.f32 %v200_v8, %v193_v13  ;;  %v1160_v17 = vmul.f32 %v200_v8, %v194_v14 }
  0x48   : > { %p911_p2 = por %p910_p13, %p909_p6 }
  0x49   : > { %v204_v18 = vand.u32 2147483647, %v1157_v16  ;;  %v207_v19 = vand.u32 2139095040, %v1157_v16  ;;  %v307_v20 = vand.u32 2147483647, %v1160_v17  ;;  %v310_v21 = vand.u32 2139095040, %v1160_v17 }
  0x4a   : > { %vm206_vm15 = vcmp.lt.s32.totalorder %v1157_v16, 0  ;;  %p912_p5 = pnand %p911_p2, %p905_p0 }
  0x4b   : > { %v208_v22 = vshrl.u32 %v207_v19, 23  ;;  %v211_v23 = vand.u32 8388607, %v204_v18  ;;  %v311_v24 = vshrl.u32 %v310_v21, 23  ;;  %v314_v25 = vand.u32 8388607, %v307_v20 }
  0x4c   : > { %vm205_vm0 = vcmp.le.f32.partialorder %v204_v18, 0.7853982 }
  0x4d   : > { %v758_v26 = vadd.s32 4294967169, %v208_v22  ;;  %v762_v27 = vadd.s32 4294967169, %v311_v24  ;;  %v212_v29 = vor.u32 8388608, %v211_v23  ;;  %v315_v30 = vor.u32 8388608, %v314_v25 }
  0x4f   : > { %v214_v28 = vadd.s32 1, %v758_v26  ;;  %v317_v31 = vadd.s32 1, %v762_v27  ;;  %v1171_v36 = vshll.u32 %v212_v29, 8  ;;  %v1173_v38 = vshll.u32 %v315_v30, 8 }
  0x51   : > { %vm215_vm1 = vcmp.gt.s32.totalorder %v214_v28, 0  ;;  %vm318_vm2 = vcmp.gt.s32.totalorder %v317_v31, 0 }
  0x52   : > { %v216_v32 = vsel %vm215_vm1, %v214_v28, 0  ;;  %v319_v35 = vsel %vm318_vm2, %v317_v31, 0  ;;  %vm309_vm1 = vcmp.lt.s32.totalorder %v1160_v17, 0  ;;  %vm308_vm2 = vcmp.le.f32.partialorder %v307_v20, 0.7853982 }
  0x53   : > { %v217_v33 = vshrl.u32 %v216_v32, 5  ;;  %v218_v34 = vand.u32 31, %v216_v32  ;;  %v321_v37 = vand.u32 31, %v319_v35  ;;  %v1175_v50 = vshrl.u32 %v319_v35, 5 }
  0x55   : > { %v219_v39 = vsub.s32 32, %v218_v34  ;;  %v221_v41 = vshll.u32 %v992_v40, %v218_v34  ;;  %v224_v43 = vshll.u32 %v993_v42, %v218_v34  ;;  %v227_v45 = vshll.u32 %v994_v44, %v218_v34 }
  0x56   : > { %v230_v47 = vshll.u32 %v995_v46, %v218_v34  ;;  %v233_v49 = vshll.u32 %v996_v48, %v218_v34  ;;  %vm236_vm3 = vcmp.lt.s32.totalorder %v217_v33, 1  ;;  %vm237_vm4 = vcmp.lt.s32.totalorder %v217_v33, 2 }
  0x57   : > { %v220_v51 = vshrl.u32 %v992_v40, %v219_v39  ;;  %v222_v52 = vshrl.u32 %v993_v42, %v219_v39  ;;  %v225_v53 = vshrl.u32 %v994_v44, %v219_v39  ;;  %v228_v54 = vshrl.u32 %v995_v46, %v219_v39 }
  0x58   : > { %v231_v55 = vshrl.u32 %v996_v48, %v219_v39  ;;  %v234_v57 = vshrl.u32 %v997_v56, %v219_v39  ;;  %vm239_vm5 = vcmp.lt.s32.totalorder %v217_v33, 4  ;;  %v322_v61 = vsub.s32 32, %v321_v37 }
  0x59   : > { %v223_v58 = vor.u32 %v222_v52, %v221_v41  ;;  %v226_v59 = vor.u32 %v225_v53, %v224_v43  ;;  %v229_v60 = vor.u32 %v228_v54, %v227_v45  ;;  %vm238_vm6 = vcmp.lt.s32.totalorder %v217_v33, 3 }
  0x5a   : > { %v232_v62 = vor.u32 %v231_v55, %v230_v47  ;;  %v235_v63 = vor.u32 %v234_v57, %v233_v49  ;;  %v324_v0 = vshll.u32 %v992_v40, %v321_v37  ;;  %v327_v9 = vshll.u32 %v993_v42, %v321_v37 }
  0x5b   : > { %v240_v1 = vsel %vm236_vm3, %v220_v51, %v223_v58  ;;  %v241_v2 = vsel %vm239_vm5, %v229_v60, 2102212464  ;;  %v244_v3 = vsel %vm236_vm3, %v223_v58, %v226_v59  ;;  %v248_v4 = vsel %vm236_vm3, %v226_v59, %v229_v60 }
  0x5c   : > { %v242_v6 = vsel %vm238_vm6, %v226_v59, %v241_v2  ;;  %v245_v7 = vsel %vm239_vm5, %v232_v62, 920167782  ;;  %v249_v8 = vsel %vm239_vm5, %v235_v63, 1326507024  ;;  %v323_v13 = vshrl.u32 %v992_v40, %v322_v61 }
  0x5d   : > { %v246_v11 = vsel %vm238_vm6, %v229_v60, %v245_v7  ;;  %v250_v12 = vsel %vm238_vm6, %v232_v62, %v249_v8  ;;  %v325_v14 = vshrl.u32 %v993_v42, %v322_v61  ;;  %v243_v19 = vsel %vm237_vm4, %v240_v1, %v242_v6 }
  0x5e   : > { %v247_v21 = vsel %vm237_vm4, %v244_v3, %v246_v11  ;;  %v251_v22 = vsel %vm237_vm4, %v248_v4, %v250_v12  ;;  %v328_v23 = vshrl.u32 %v994_v44, %v322_v61  ;;  %v330_v30 = vshll.u32 %v994_v44, %v321_v37 }
  0x5f   : > { %v1184_v24 = vmul.u32.u64.low %v1171_v36, %v251_v22  ;;  %v1185_v25 = vmul.u32.u64.high %v1171_v36, %v251_v22, %v1184_v24  ;;  %v1188_v26 = vmul.u32.u64.low %v1171_v36, %v247_v21  ;;  %v1189_v27 = vmul.u32.u64.high %v1171_v36, %v247_v21, %v1188_v26 }
  0x60   : > { %v326_v28 = vor.u32 %v325_v14, %v324_v0  ;;  %v329_v29 = vor.u32 %v328_v23, %v327_v9  ;;  %v331_v31 = vshrl.u32 %v995_v46, %v322_v61  ;;  %v333_v32 = vshll.u32 %v995_v46, %v321_v37 }
  0x61   : > { %v334_v34 = vshrl.u32 %v996_v48, %v322_v61  ;;  %v336_v35 = vshll.u32 %v996_v48, %v321_v37  ;;  %v337_v39 = vshrl.u32 %v997_v56, %v322_v61  ;;  %v259_v33 = vmul.u32 %v1171_v36, %v243_v19 }
  0x62   : > { %v332_v40 = vor.u32 %v331_v31, %v330_v30  ;;  %vm339_vm7 = vcmp.lt.s32.totalorder %v1175_v50, 1  ;;  %vm340_vm8 = vcmp.lt.s32.totalorder %v1175_v50, 2  ;;  %vm261_vm9 = vc.u32 %v1185_v25, %v1188_v26 }
  0x63   : > { %v262_v41 = vadd.s32 1, %v1189_v27  ;;  %v335_v42 = vor.u32 %v334_v34, %v333_v32  ;;  %vm341_vm10 = vcmp.lt.s32.totalorder %v1175_v50, 3  ;;  %v338_v43 = vor.u32 %v337_v39, %v336_v35 }
  0x64   : > { %vm342_vm11 = vcmp.lt.s32.totalorder %v1175_v50, 4  ;;  %v343_v44 = vsel %vm339_vm7, %v323_v13, %v326_v28  ;;  %v347_v37 = vsel %vm339_vm7, %v326_v28, %v329_v29  ;;  %v351_v47 = vsel %vm339_vm7, %v329_v29, %v332_v40 }
  0x65   : > { %v263_v45 = vsel %vm261_vm9, %v262_v41, %v1189_v27  ;;  %v344_v36 = vsel %vm342_vm11, %v332_v40, 2102212464  ;;  %v348_v46 = vsel %vm342_vm11, %v335_v42, 920167782  ;;  %v352_v52 = vsel %vm342_vm11, %v338_v43, 1326507024 }
  0x66   : > { %v264_v48 = vadd.s32 %v263_v45, %v259_v33  ;;  %v345_v49 = vsel %vm341_vm10, %v329_v29, %v344_v36  ;;  %v349_v51 = vsel %vm341_vm10, %v332_v40, %v348_v46  ;;  %v353_v55 = vsel %vm341_vm10, %v335_v42, %v352_v52 }
  0x67   : > { %v346_v53 = vsel %vm340_vm8, %v343_v44, %v345_v49  ;;  %v350_v54 = vsel %vm340_vm8, %v347_v37, %v349_v51  ;;  %v354_v57 = vsel %vm340_vm8, %v351_v47, %v353_v55  ;;  %v260_v22 = vadd.s32 %v1188_v26, %v1185_v25 }
  0x68   : > { %v265_v56 = vadd.s32 536870912, %v264_v48  ;;  %v1206_v58 = vmul.u32.u64.low %v1173_v38, %v350_v54  ;;  %v1207_v59 = vmul.u32.u64.high %v1173_v38, %v350_v54, %v1206_v58  ;;  %v362_v63 = vmul.u32 %v1173_v38, %v346_v53 }
  0x69   : > { %v1210_v60 = vmul.u32.u64.low %v1173_v38, %v354_v57  ;;  %v1211_v61 = vmul.u32.u64.high %v1173_v38, %v354_v57, %v1210_v60  ;;  %vm296_vm11 = vweird.f32 %v1157_v16 }
  0x6a   : > { %v1213_v62 = vshrl.u32 %v265_v56, 30  ;;  %v365_v1 = vadd.s32 1, %v1207_v59 }
  0x6b   : > { %vm364_vm12 = vc.u32 %v1211_v61, %v1206_v58  ;;  %v363_v32 = vadd.s32 %v1206_v58, %v1211_v61 }
  0x6c   : > { %v267_v0 = vshll.u32 %v1213_v62, 30  ;;  %v366_v2 = vsel %vm364_vm12, %v365_v1, %v1207_v59  ;;  %v290_v55 = vsub.s32 4, %v1213_v62 }
  0x6d   : > { %v367_v3 = vadd.s32 %v366_v2, %v362_v63 }
  0x6e   : > { %v268_v50 = vsub.s32 %v264_v48, %v267_v0  ;;  %v291_v57 = vsel %vm206_vm15, %v290_v55, %v1213_v62 }
  0x6f   : > { %v368_v6 = vadd.s32 536870912, %v367_v3  ;;  %v293_v18 = vsel %vm205_vm0, 0, %v291_v57 }
  0x70   : > { %v270_v4 = vsub.s32 0, %v268_v50  ;;  %v503_v60 = vadd.s32 3, %v293_v18  ;;  %v297_v1 = vand.u32 3, %v293_v18 }
  0x71   : > { %v369_v8 = vshrl.u32 %v368_v6, 30 }
  0x72   : > { %v759_v7 = vmin.u32 %v270_v4, %v268_v50  ;;  %v504_v20 = vand.u32 3, %v503_v60  ;;  %vm299_vm3 = vcmp.eq.s32.totalorder %v297_v1, 0  ;;  %vm302_vm4 = vcmp.eq.s32.totalorder %v297_v1, 2 }
  0x73   : > { %v370_v11 = vshll.u32 %v369_v8, 30  ;;  %v393_v58 = vsub.s32 4, %v369_v8  ;;  %vm298_vm5 = vcmp.lt.s32.totalorder %v297_v1, 2 }
  0x74   : > { %v272_v9 = vclz %v759_v7  ;;  %vm506_vm6 = vcmp.eq.s32.totalorder %v504_v20, 0  ;;  %vm509_vm7 = vcmp.eq.s32.totalorder %v504_v20, 2  ;;  %vm505_vm10 = vcmp.lt.s32.totalorder %v504_v20, 2 }
  0x75   : > { %v371_v13 = vsub.s32 %v367_v3, %v370_v11  ;;  %v394_v59 = vsel %vm309_vm1, %v393_v58, %v369_v8 }
  0x76   : > { %v760_v12 = vadd.s32 4294967294, %v272_v9  ;;  %v396_v63 = vsel %vm308_vm2, 0, %v394_v59 }
  0x77   : > { %v373_v14 = vsub.s32 0, %v371_v13  ;;  %v400_v7 = vand.u32 3, %v396_v63 }
  0x78   : > { %vm761_vm13 = vcmp.lt.s32.totalorder %v760_v12, 0 }
  0x79   : > { %v275_v38 = vsel %vm761_vm13, 0, %v760_v12  ;;  %v763_v21 = vmin.u32 %v373_v14, %v371_v13  ;;  %vm402_vm8 = vcmp.eq.s32.totalorder %v400_v7, 0  ;;  %vm405_vm9 = vcmp.eq.s32.totalorder %v400_v7, 2 }
  0x7a   : > { %v280_v19 = vsub.s32 4294967266, %v275_v38  ;;  %v276_v23 = vsub.s32 32, %v275_v38  ;;  %v277_v29 = vshll.u32 %v268_v50, %v275_v38  ;;  %v607_v50 = vadd.s32 3, %v396_v63 }
  0x7b   : > { %v375_v27 = vclz %v763_v21 }
  0x7c   : > { %v281_v24 = vadd.s32 127, %v280_v19  ;;  %v278_v30 = vshrl.u32 %v260_v22, %v276_v23  ;;  %v608_v62 = vand.u32 3, %v607_v50 }
  0x7d   : > { %v764_v28 = vadd.s32 4294967294, %v375_v27 }
  0x7e   : > { %v282_v31 = vshll.u32 %v281_v24, 23  ;;  %v279_v33 = vor.u32 %v278_v30, %v277_v29  ;;  %vm610_vm12 = vcmp.eq.s32.totalorder %v608_v62, 0  ;;  %vm613_vm13 = vcmp.eq.s32.totalorder %v608_v62, 2 }
  0x7f   : > { %vm765_vm14 = vcmp.lt.s32.totalorder %v764_v28, 0 }
  0x80   : > { %v378_v34 = vsel %vm765_vm14, 0, %v764_v28  ;;  %v283_v40 = vor.u32 4788187, %v282_v31  ;;  %v286_v26 = vcvt.s32.f32 %v279_v33  ;;  %vm401_vm14 = vcmp.lt.s32.totalorder %v400_v7, 2 }
  0x81   : > { %v379_v35 = vsub.s32 32, %v378_v34  ;;  %v383_v39 = vsub.s32 4294967266, %v378_v34  ;;  %v380_v41 = vshll.u32 %v371_v13, %v378_v34 }
  0x82   : > { %v284_v25 = vand.u32 2147483647, %v283_v40 }
  0x83   : > { %v381_v42 = vshrl.u32 %v363_v32, %v379_v35  ;;  %v384_v43 = vadd.s32 127, %v383_v39 }
  0x84   : > { %v287_v36 = vmul.f32 %v286_v26, %v284_v25 }
  0x85   : > { %v385_v44 = vshll.u32 %v384_v43, 23  ;;  %v382_v37 = vor.u32 %v381_v42, %v380_v41 }
  0x86   : > { %v288_v48 = vxor.u32 2147483648, %v287_v36 }
  0x87   : > { %v386_v45 = vor.u32 4788187, %v385_v44  ;;  %v389_v47 = vcvt.s32.f32 %v382_v37 }
  0x88   : > { %v289_v51 = vsel %vm206_vm15, %v288_v48, %v287_v36  ;;  %vm609_vm15 = vcmp.lt.s32.totalorder %v608_v62, 2 }
  0x89   : > { %v387_v46 = vand.u32 2147483647, %v386_v45  ;;  %v292_v53 = vsel %vm205_vm0, %v1157_v16, %v289_v51  ;;  %vm399_vm0 = vweird.f32 %v1160_v17 }
  0x8a   : > { %864 = vcosq.f32 %v292_v53 }
  0x8b   : > { %v390_v49 = vmul.f32 %v389_v47, %v387_v46  ;;  %866 = vsinq.f32 %v292_v53 }
  0x8d   : > { %v391_v52 = vxor.u32 2147483648, %v390_v49 }
  0x8f   : > { %v392_v54 = vsel %vm309_vm1, %v391_v52, %v390_v49  ;;  %vm634_vm1 = vcmp.eq.s32.totalorder %v1155_v15, 1 }
  0x90   : > { %v395_v56 = vsel %vm308_vm2, %v1160_v17, %v392_v54 }
  0x91   : > { %868 = vcosq.f32 %v395_v56 }
  0x92   : > { %870 = vsinq.f32 %v395_v56 }
  0x94   : > { %v865_v61 = vpop.eup %864 }
  0x95   : > { %v867_v0 = vpop.eup %866  ;;  %v303_v4 = vxor.u32 2147483648, %v865_v61 }
  0x96   : > { %v300_v3 = vxor.u32 2147483648, %v867_v0 }
  0x97   : > { %v304_v8 = vsel %vm302_vm4, %v303_v4, %v867_v0  ;;  %v511_v38 = vsel %vm509_vm7, %v303_v4, %v867_v0 }
  0x98   : > { %v301_v9 = vsel %vm299_vm3, %v865_v61, %v300_v3  ;;  %v508_v13 = vsel %vm506_vm6, %v865_v61, %v300_v3 }
  0x99   : > { %v305_v14 = vsel %vm298_vm5, %v301_v9, %v304_v8  ;;  %v512_v22 = vsel %vm505_vm10, %v508_v13, %v511_v38 }
  0x9a   : > { %v306_v23 = vsel %vm296_vm11, nan, %v305_v14  ;;  %v513_v29 = vsel %vm296_vm11, nan, %v512_v22 }
  0x9b   : > { %v869_v2 = vpop.eup %868  ;;  %v637_v16 = vmul.f32 %v1146_v5, %v306_v23 }
  0x9c   : > { %v871_v6 = vpop.eup %870  ;;  %v406_v12 = vxor.u32 2147483648, %v869_v2 }
  0x9d   : > { %v403_v11 = vxor.u32 2147483648, %v871_v6 }
  0x9e   : > { %v407_v21 = vsel %vm405_vm9, %v406_v12, %v871_v6  ;;  %v615_v27 = vsel %vm613_vm13, %v406_v12, %v871_v6 }
  0x9f   : > { %v404_v19 = vsel %vm402_vm8, %v869_v2, %v403_v11  ;;  %v612_v24 = vsel %vm610_vm12, %v869_v2, %v403_v11 }
  0xa0   : > { %v408_v28 = vsel %vm401_vm14, %v404_v19, %v407_v21  ;;  %v616_v32 = vsel %vm609_vm15, %v612_v24, %v615_v27 }
  0xa1   : > { %v409_v34 = vsel %vm399_vm0, nan, %v408_v28  ;;  %v617_v33 = vsel %vm399_vm0, nan, %v616_v32 }
  0xa2   : > { %v638_v40 = vmul.f32 %v1153_v10, %v409_v34 }
  0xaf   : > { %v626_v30 = vpop.permute.xlu1 %625 }
  0xb0   : > { %v622_v31 = vpop.permute.xlu0 %621 }
  0xb1   : > { %v635_v35 = vsel %vm634_vm1, %v626_v30, %v622_v31 }
  0xb2   : > { %v639_v39 = vmul.f32 %v635_v35, %v513_v29 }
  0xb3   : > { %v628_v41 = vpop.permute.xlu1 %627 }
  0xb4   : > { %v641_v17 = vadd.f32 %v639_v39, %v637_v16  ;;  %v624_v42 = vpop.permute.xlu0 %623 }
  0xb5   : > { %v636_v5 = vsel %vm634_vm1, %v628_v41, %v624_v42 }
  0xb6   : > { %643 = vst [vmem:[%s181_s25] sm:$0xff] %v641_v17  ;;  %v640_v43 = vmul.f32 %v636_v5, %v617_v33 }
  0xb8   : > { %v642_v10 = vadd.f32 %v640_v43, %v638_v40 }
  0xba   : > { %644 = vst [vmem:[%s181_s25 + $0x8] sm:$0xff] %v642_v10 }
  0xbb   : > { %915 = shalt.err (!%p912_p5)
}
  0xbc   : > { %s916_s13 = scalar_lea.hbm %s1249_s30, 256  ;;  %s920_s9 = scalar_lea.hbm %s1301_s3, 512 }
  0xbd   : > { %p917_p4 = scmp.ne.s32.totalorder %s1249_s30, %s916_s13  ;;  %p921_p12 = scmp.lt.u32.totalorder %s1249_s30, %s1301_s3 }
  0xbe   : > { %p922_p1 = scmp.lt.u32.totalorder %s920_s9, %s916_s13  ;;  %p924_p8 = scmp.lt.u32.totalorder %s916_s13, %s1249_s30 }
  0xbf   : > { %p918_p7 = pnand %p917_p4, %p1309_p9 }
  0xc0   : > { %p923_p3 = por %p922_p1, %p921_p12 }
  0xc1   : > { %p919_p10 = pneg %p918_p7 }
  0xc2   : > { %p925_p11 = por %p924_p8, %p923_p3 }
  0xc4   : > { %p926_p0 = pnand %p925_p11, %p919_p10 }
  0xc6   : > { %929 = shalt.err (!%p926_p0)
}
  0xc7   : > { %s999_s20 = smov 128   ;;  %s1000_s25 = smov 8  }
  0xc8   : > { %791 = dma.vmem_to_hbm [thread:$0]  (%p1309_p9), %s1244_s22, 256, %s1249_s30, %s646_s4, %s999_s20, %s999_s20, %s1000_s25  }
  0xc9 PF: > { %s676_s23 = sand.u32 1, %s964_s14   ;;  %p1310_p6 = scmp.ne.s32.totalorder %s1306_s28, 0 }
  0xca   : > { %p1311_p13 = scmp.ge.s32.totalorder %s984_s19, 2  ;;  %s677_s24 = scalar_lea.sflag [#allocation6], %s676_s23 }
  0xcc   : > { %p798_p2 = pnand %p1311_p13, %p1310_p6 }
  0xce   : > { %959 = dma.done.wait (!%p798_p2), %s677_s24, 256  }
  0xcf   : > { %961 = vsyncadd (!%p798_p2), %s677_s24, 4294967040  ;;  %s20_s19 = sadd.s32 1, %s984_s19   ;;  %s1312_s14 = smov %s968_s15 }
  0xd0   : > { %p17_p5 = scmp.ge.s32.totalorder %s20_s19, 4   ;;  %s1313_s15 = smov %s972_s16 }
  0xd1   : > { %s1314_s16 = smov %s1080_s27  ;;  %s1315_s17 = smov %s980_s18 }
  0xd2   : > { %s1316_s18 = smov %s1318_s21  ;;  %19 = sbr.rel (!%p17_p5) target bundleno = 8 (0x8), region = 73 }
  0xd9   :  { %682 = vsyncpa [#allocation5], 1 }
  0xda   :  { %684 = vsyncpa [#allocation5 + $0x1], 1 }
  0xdb   :  { %685 = vsyncpa [#allocation6], 1 }
  0xdc   :  { %687 = vsyncpa [#allocation6 + $0x1], 1 }

</bundles_post_ra>
